<compile_context>
chip_gen: v7x
topology: tpu7x:2x2x1
jax: 0.10.0
libtpu: 0.0.40
codegen_flags: <defaults>
</compile_context>

<pallas_src>
import functools

import jax
import jax.numpy as jnp
from jax import lax
from jax.experimental import pallas as pl
from jax.experimental.pallas import tpu as pltpu

_EPS = 1e-8           # PyTorch F.cosine_similarity default eps (per-norm clamp)
_LANE = 128
_C_STATIC = 32        # fully unroll the channel loop up to this many channels
_STATIC_STRIPS = 16   # fully unroll the row-strip loop up to this many strips


# --------------------------------------------------------------------------
# Shared math helpers
# --------------------------------------------------------------------------
def _accumulate(acc, p, ph, g, gh):
    """Add one channel's contribution to the 9 running sums (all f32)."""
    p = p.astype(jnp.float32)
    ph = ph.astype(jnp.float32)
    g = g.astype(jnp.float32)
    gh = gh.astype(jnp.float32)
    n_p, n_ph, n_g, n_gh, d_p_ph, d_g_gh, d_p_g, d_p_gh, d_g_ph = acc
    return (n_p + p * p, n_ph + ph * ph, n_g + g * g, n_gh + gh * gh,
            d_p_ph + p * ph, d_g_gh + g * gh,
            d_p_g + p * g, d_p_gh + p * gh, d_g_ph + g * ph)


def _combine(acc, gamma):
    """Turn the 9 sums into the loss tile.  One rsqrt per norm (EUP slot)."""
    n_p, n_ph, n_g, n_gh, d_p_ph, d_g_gh, d_p_g, d_p_gh, d_g_ph = acc
    eps2 = _EPS * _EPS
    r_p = lax.rsqrt(jnp.maximum(n_p, eps2))      # == 1 / max(||P||, eps)
    r_ph = lax.rsqrt(jnp.maximum(n_ph, eps2))
    r_g = lax.rsqrt(jnp.maximum(n_g, eps2))
    r_gh = lax.rsqrt(jnp.maximum(n_gh, eps2))
    pos = ((1.0 - jnp.abs(d_p_ph) * (r_p * r_ph))
           + (1.0 - jnp.abs(d_g_gh) * (r_g * r_gh)))
    neg = (jnp.abs(d_p_g) * (r_p * r_g)
           + jnp.abs(d_p_gh) * (r_p * r_gh)
           + jnp.abs(d_g_ph) * (r_g * r_ph))
    return pos + gamma * neg


# --------------------------------------------------------------------------
# Kernel 1: whole channel axis per block (common path)
# --------------------------------------------------------------------------
def _strip_sums(p_ref, ph_ref, g_ref, gh_ref, r, rows, n_chan):
    """9 accumulated (rows, 128) f32 sums for sublane rows [r, r + rows)."""
    acc = (jnp.zeros((rows, _LANE), jnp.float32),) * 9
    if n_chan <= _C_STATIC:
        for c in range(n_chan):            # fully unrolled; r may be traced
            acc = _accumulate(acc,
                              p_ref[c, pl.ds(r, rows), :],
                              ph_ref[c, pl.ds(r, rows), :],
                              g_ref[c, pl.ds(r, rows), :],
                              gh_ref[c, pl.ds(r, rows), :])
    else:
        # Wrapper guarantees r is a static Python int on this path, so these
        # views are static; only the channel index is dynamic.
        pv = p_ref.at[:, pl.ds(r, rows), :]
        phv = ph_ref.at[:, pl.ds(r, rows), :]
        gv = g_ref.at[:, pl.ds(r, rows), :]
        ghv = gh_ref.at[:, pl.ds(r, rows), :]

        def body(c, carry):
            return _accumulate(carry, pv[c], phv[c], gv[c], ghv[c])

        acc = lax.fori_loop(0, n_chan, body, acc, unroll=8)
    return acc


def _ortho_kernel(p_ref, ph_ref, g_ref, gh_ref, out_ref, *, gamma, n_chan, strip):
    """Refs are (C, tile_s, 128); out_ref is (tile_s, 128) f32."""
    tile_s = out_ref.shape[0]
    n_full, rem = divmod(tile_s, strip)

    def do_rows(r, rows):
        acc = _strip_sums(p_ref, ph_ref, g_ref, gh_ref, r, rows, n_chan)
        out_ref[pl.ds(r, rows), :] = _combine(acc, gamma)

    if n_full > _STATIC_STRIPS:
        @pl.loop(0, n_full)
        def _strips(i):
            do_rows(pl.multiple_of(i * strip, strip), strip)
    else:
        for i in range(n_full):
            do_rows(i * strip, strip)
    if rem:
        do_rows(n_full * strip, rem)


# --------------------------------------------------------------------------
# Kernel 2: huge-C guard -- channels chunked over a trailing reduction axis
# --------------------------------------------------------------------------
def _ortho_kernel_chunked(p_ref, ph_ref, g_ref, gh_ref, out_ref, acc_ref, *,
                          gamma, c_chunk):
    """Refs are (c_chunk, tile_s, 128); acc_ref is (9, tile_s, 128) f32 scratch."""
    ci = pl.program_id(2)

    @pl.when(ci == 0)
    def _init():
        acc_ref[...] = jnp.zeros_like(acc_ref)

    acc = tuple(acc_ref[k] for k in range(9))
    if c_chunk <= _C_STATIC:
        for c in range(c_chunk):
            acc = _accumulate(acc, p_ref[c], ph_ref[c], g_ref[c], gh_ref[c])
    else:
        def body(c, carry):
            return _accumulate(carry, p_ref[c], ph_ref[c], g_ref[c], gh_ref[c])
        acc = lax.fori_loop(0, c_chunk, body, acc, unroll=8)
    for k in range(9):
        acc_ref[k] = acc[k]

    @pl.when(ci == pl.num_programs(2) - 1)
    def _finalize():
        out_ref[...] = _combine(acc, gamma)


# --------------------------------------------------------------------------
# Wrapper
# --------------------------------------------------------------------------
def orthogonal_loss(P, P_hat, G, G_hat, gamma=0.5, *,
                    vmem_budget_bytes=24 * 1024 * 1024,
                    max_tile_rows=1024,
                    interpret=False):
    """P, P_hat, G, G_hat: (B, C, H, W).  Returns the (B, H, W) f32 loss."""
    B, C, H, W = P.shape
    for x in (P_hat, G, G_hat):
        assert x.shape == P.shape, "all four inputs must share a shape"
    dtype = jnp.result_type(P, P_hat, G, G_hat)
    itemsize = jnp.dtype(dtype).itemsize
    pack = max(8, 32 // itemsize)          # sublane rows per native VMEM tile
    HW = H * W
    S = pl.cdiv(HW, _LANE)                 # number of 128-lane pixel columns
    HW_pad = S * _LANE

    def prep(x):
        x = jnp.asarray(x, dtype).reshape(B, C, HW)
        if HW_pad != HW:
            x = jnp.pad(x, ((0, 0), (0, 0), (0, HW_pad - HW)))
        return x.reshape(B, C, S, _LANE)

    args = [prep(x) for x in (P, P_hat, G, G_hat)]

    vmem_limit = 32 * 1024 * 1024
    bytes_per_row_in = 4 * 2 * C * _LANE * itemsize   # 4 inputs, double-buffered
    bytes_per_row_out = 2 * _LANE * 4                 # f32 output, double-buffered
    rows_fit = vmem_budget_bytes // (bytes_per_row_in + bytes_per_row_out)

    if rows_fit >= pack:
        # ---- common path: the whole channel axis fits in one block ----
        # Keep the in-kernel strip loop static whenever the channel loop is
        # dynamic (C > _C_STATIC) so indexing stays static-leading + pl.ds.
        cap = max_tile_rows if C <= _C_STATIC else _STATIC_STRIPS * pack
        tile_s = min(rows_fit, cap, S)
        if tile_s < S:
            tile_s = max(pack, tile_s // pack * pack)
        n_s = pl.cdiv(S, tile_s)
        if B * n_s < 2 and S > pack:
            # v7x megacore: guarantee >= 2 parallel grid steps.
            half = (-(-S // 2) + pack - 1) // pack * pack
            if half < S:
                tile_s = half
                n_s = pl.cdiv(S, tile_s)
        grid = (B, n_s)
        in_spec = pl.BlockSpec((pl.Squeezed(), C, tile_s, _LANE),
                               lambda b, s: (b, 0, s, 0))
        out_spec = pl.BlockSpec((pl.Squeezed(), tile_s, _LANE),
                                lambda b, s: (b, s, 0))
        out = pl.pallas_call(
            functools.partial(_ortho_kernel, gamma=float(gamma), n_chan=C,
                              strip=pack),
            out_shape=jax.ShapeDtypeStruct((B, S, _LANE), jnp.float32),
            grid=grid,
            in_specs=[in_spec] * 4,
            out_specs=out_spec,
            compiler_params=pltpu.CompilerParams(
                dimension_semantics=("parallel", "parallel"),
                vmem_limit_bytes=vmem_limit),
            interpret=interpret,
        )(*args)
    else:
        # ---- huge-C guard: chunk C over a trailing "arbitrary" grid axis ----
        tile_s = min(S, pack)
        acc_rows = -(-tile_s // 8) * 8
        fixed_bytes = (9 + 2) * acc_rows * _LANE * 4     # scratch acc + out bufs
        per_chan_bytes = 4 * 2 * pack * _LANE * itemsize
        c_max = max(1, min(C, (vmem_budget_bytes - fixed_bytes) // per_chan_bytes))
        c_chunk = 1
        for d in range(c_max, 0, -1):                    # largest divisor of C
            if C % d == 0:
                c_chunk = d
                break
        # Deeper input buffering only if the chunks (hence DMAs) end up tiny.
        spec_kwargs = {}
        step_bytes = 4 * c_chunk * pack * _LANE * itemsize
        if step_bytes < (1 << 20):
            spec_kwargs["pipeline_mode"] = pl.Buffered(3)
        grid = (B, pl.cdiv(S, tile_s), C // c_chunk)
        in_spec = pl.BlockSpec((pl.Squeezed(), c_chunk, tile_s, _LANE),
                               lambda b, s, c: (b, c, s, 0), **spec_kwargs)
        out_spec = pl.BlockSpec((pl.Squeezed(), tile_s, _LANE),
                                lambda b, s, c: (b, s, 0))
        out = pl.pallas_call(
            functools.partial(_ortho_kernel_chunked, gamma=float(gamma),
                              c_chunk=c_chunk),
            out_shape=jax.ShapeDtypeStruct((B, S, _LANE), jnp.float32),
            grid=grid,
            in_specs=[in_spec] * 4,
            out_specs=out_spec,
            scratch_shapes=[pltpu.VMEM((9, tile_s, _LANE), jnp.float32)],
            compiler_params=pltpu.CompilerParams(
                dimension_semantics=("parallel", "parallel", "arbitrary"),
                vmem_limit_bytes=vmem_limit),
            interpret=interpret,
        )(*args)

    return out.reshape(B, HW_pad)[:, :HW].reshape(B, H, W)


# --------------------------------------------------------------------------
# Pure-JAX reference (matches current PyTorch per-norm eps clamping)
# --------------------------------------------------------------------------
def _reference(P, P_hat, G, G_hat, gamma=0.5):
    def cos(x, y):
        x = x.astype(jnp.float32)
        y = y.astype(jnp.float32)
        dot = jnp.sum(x * y, axis=1)
        nx = jnp.sqrt(jnp.maximum(jnp.sum(x * x, axis=1), _EPS * _EPS))
        ny = jnp.sqrt(jnp.maximum(jnp.sum(y * y, axis=1), _EPS * _EPS))
        return dot / (nx * ny)

    pos = (1 - jnp.abs(cos(P, P_hat))) + (1 - jnp.abs(cos(G, G_hat)))
    neg = jnp.abs(cos(P, G)) + jnp.abs(cos(P, G_hat)) + jnp.abs(cos(G, P_hat))
    return pos + gamma * neg


if __name__ == "__main__":
    key = jax.random.PRNGKey(0)

    configs = [
        # (B, C, H, W, dtype) -- exercises: main small-C path; bf16 + HW pad;
        # dynamic strip loop + in-kernel tail; huge-C chunked reduction path.
        (2, 4, 16, 16, jnp.float32),
        (1, 8, 20, 20, jnp.bfloat16),
        (2, 4, 132, 132, jnp.float32),
        (1, 768, 16, 16, jnp.float32),
    ]
    for (B, C, H, W, dtype) in configs:
        key, *ks = jax.random.split(key, 5)
        P, P_hat, G, G_hat = (jax.random.normal(k, (B, C, H, W), dtype=dtype)
                              for k in ks)
        loss = jax.block_until_ready(orthogonal_loss(P, P_hat, G, G_hat, gamma=0.5))
        ref = _reference(P, P_hat, G, G_hat, gamma=0.5)
        assert loss.shape == (B, H, W)
        assert jnp.allclose(loss, ref, atol=1e-4, rtol=1e-4), (
            f"mismatch vs reference for shape {(B, C, H, W)} {jnp.dtype(dtype).name}")

    print("KERNEL_OK")
</pallas_src>

<mosaic_0001>
module attributes {stable_mosaic.version = 11 : i64} {
  func.func @_ortho_kernel(%arg0: i32, %arg1: i32, %arg2: memref<1x4x2x128xf32, #tpu.memory_space<vmem>>, %arg3: memref<1x4x2x128xf32, #tpu.memory_space<vmem>>, %arg4: memref<1x4x2x128xf32, #tpu.memory_space<vmem>>, %arg5: memref<1x4x2x128xf32, #tpu.memory_space<vmem>>, %arg6: memref<1x2x128xf32, #tpu.memory_space<vmem>>) attributes {dimension_semantics = [#tpu.dimension_semantics<parallel>, #tpu.dimension_semantics<parallel>], iteration_bounds = array<i64: 2, 1>, scalar_prefetch = 0 : i64, scratch_operands = 0 : i64, tpu.core_type = #tpu.core_type<tc>, window_params = [{transform_indices = @transform_0, window_bounds = array<i64: 1, 4, 2, 128>}, {transform_indices = @transform_1, window_bounds = array<i64: 1, 4, 2, 128>}, {transform_indices = @transform_2, window_bounds = array<i64: 1, 4, 2, 128>}, {transform_indices = @transform_3, window_bounds = array<i64: 1, 4, 2, 128>}, {transform_indices = @transform_4, window_bounds = array<i64: 1, 2, 128>}]} {
    %cst = arith.constant 0.000000e+00 : f32
    %0 = vector.broadcast %cst : f32 to vector<2x128xf32>
    %c0 = arith.constant 0 : index
    %c0_0 = arith.constant 0 : index
    %c0_1 = arith.constant 0 : index
    %c0_2 = arith.constant 0 : index
    %1 = vector.load %arg2[%c0, %c0_0, %c0_1, %c0_2] : memref<1x4x2x128xf32, #tpu.memory_space<vmem>>, vector<1x1x2x128xf32>
    %2 = vector.shape_cast %1 : vector<1x1x2x128xf32> to vector<2x128xf32>
    %c0_3 = arith.constant 0 : index
    %c0_4 = arith.constant 0 : index
    %c0_5 = arith.constant 0 : index
    %c0_6 = arith.constant 0 : index
    %3 = vector.load %arg3[%c0_3, %c0_4, %c0_5, %c0_6] : memref<1x4x2x128xf32, #tpu.memory_space<vmem>>, vector<1x1x2x128xf32>
    %4 = vector.shape_cast %3 : vector<1x1x2x128xf32> to vector<2x128xf32>
    %c0_7 = arith.constant 0 : index
    %c0_8 = arith.constant 0 : index
    %c0_9 = arith.constant 0 : index
    %c0_10 = arith.constant 0 : index
    %5 = vector.load %arg4[%c0_7, %c0_8, %c0_9, %c0_10] : memref<1x4x2x128xf32, #tpu.memory_space<vmem>>, vector<1x1x2x128xf32>
    %6 = vector.shape_cast %5 : vector<1x1x2x128xf32> to vector<2x128xf32>
    %c0_11 = arith.constant 0 : index
    %c0_12 = arith.constant 0 : index
    %c0_13 = arith.constant 0 : index
    %c0_14 = arith.constant 0 : index
    %7 = vector.load %arg5[%c0_11, %c0_12, %c0_13, %c0_14] : memref<1x4x2x128xf32, #tpu.memory_space<vmem>>, vector<1x1x2x128xf32>
    %8 = vector.shape_cast %7 : vector<1x1x2x128xf32> to vector<2x128xf32>
    %9 = arith.mulf %2, %2 : vector<2x128xf32>
    %10 = arith.addf %0, %9 : vector<2x128xf32>
    %11 = arith.mulf %4, %4 : vector<2x128xf32>
    %12 = arith.addf %0, %11 : vector<2x128xf32>
    %13 = arith.mulf %6, %6 : vector<2x128xf32>
    %14 = arith.addf %0, %13 : vector<2x128xf32>
    %15 = arith.mulf %8, %8 : vector<2x128xf32>
    %16 = arith.addf %0, %15 : vector<2x128xf32>
    %17 = arith.mulf %2, %4 : vector<2x128xf32>
    %18 = arith.addf %0, %17 : vector<2x128xf32>
    %19 = arith.mulf %6, %8 : vector<2x128xf32>
    %20 = arith.addf %0, %19 : vector<2x128xf32>
    %21 = arith.mulf %2, %6 : vector<2x128xf32>
    %22 = arith.addf %0, %21 : vector<2x128xf32>
    %23 = arith.mulf %2, %8 : vector<2x128xf32>
    %24 = arith.addf %0, %23 : vector<2x128xf32>
    %25 = arith.mulf %6, %4 : vector<2x128xf32>
    %26 = arith.addf %0, %25 : vector<2x128xf32>
    %c0_15 = arith.constant 0 : index
    %c1 = arith.constant 1 : index
    %c0_16 = arith.constant 0 : index
    %c0_17 = arith.constant 0 : index
    %27 = vector.load %arg2[%c0_15, %c1, %c0_16, %c0_17] : memref<1x4x2x128xf32, #tpu.memory_space<vmem>>, vector<1x1x2x128xf32>
    %28 = vector.shape_cast %27 : vector<1x1x2x128xf32> to vector<2x128xf32>
    %c0_18 = arith.constant 0 : index
    %c1_19 = arith.constant 1 : index
    %c0_20 = arith.constant 0 : index
    %c0_21 = arith.constant 0 : index
    %29 = vector.load %arg3[%c0_18, %c1_19, %c0_20, %c0_21] : memref<1x4x2x128xf32, #tpu.memory_space<vmem>>, vector<1x1x2x128xf32>
    %30 = vector.shape_cast %29 : vector<1x1x2x128xf32> to vector<2x128xf32>
    %c0_22 = arith.constant 0 : index
    %c1_23 = arith.constant 1 : index
    %c0_24 = arith.constant 0 : index
    %c0_25 = arith.constant 0 : index
    %31 = vector.load %arg4[%c0_22, %c1_23, %c0_24, %c0_25] : memref<1x4x2x128xf32, #tpu.memory_space<vmem>>, vector<1x1x2x128xf32>
    %32 = vector.shape_cast %31 : vector<1x1x2x128xf32> to vector<2x128xf32>
    %c0_26 = arith.constant 0 : index
    %c1_27 = arith.constant 1 : index
    %c0_28 = arith.constant 0 : index
    %c0_29 = arith.constant 0 : index
    %33 = vector.load %arg5[%c0_26, %c1_27, %c0_28, %c0_29] : memref<1x4x2x128xf32, #tpu.memory_space<vmem>>, vector<1x1x2x128xf32>
    %34 = vector.shape_cast %33 : vector<1x1x2x128xf32> to vector<2x128xf32>
    %35 = arith.mulf %28, %28 : vector<2x128xf32>
    %36 = arith.addf %10, %35 : vector<2x128xf32>
    %37 = arith.mulf %30, %30 : vector<2x128xf32>
    %38 = arith.addf %12, %37 : vector<2x128xf32>
    %39 = arith.mulf %32, %32 : vector<2x128xf32>
    %40 = arith.addf %14, %39 : vector<2x128xf32>
    %41 = arith.mulf %34, %34 : vector<2x128xf32>
    %42 = arith.addf %16, %41 : vector<2x128xf32>
    %43 = arith.mulf %28, %30 : vector<2x128xf32>
    %44 = arith.addf %18, %43 : vector<2x128xf32>
    %45 = arith.mulf %32, %34 : vector<2x128xf32>
    %46 = arith.addf %20, %45 : vector<2x128xf32>
    %47 = arith.mulf %28, %32 : vector<2x128xf32>
    %48 = arith.addf %22, %47 : vector<2x128xf32>
    %49 = arith.mulf %28, %34 : vector<2x128xf32>
    %50 = arith.addf %24, %49 : vector<2x128xf32>
    %51 = arith.mulf %32, %30 : vector<2x128xf32>
    %52 = arith.addf %26, %51 : vector<2x128xf32>
    %c0_30 = arith.constant 0 : index
    %c2 = arith.constant 2 : index
    %c0_31 = arith.constant 0 : index
    %c0_32 = arith.constant 0 : index
    %53 = vector.load %arg2[%c0_30, %c2, %c0_31, %c0_32] : memref<1x4x2x128xf32, #tpu.memory_space<vmem>>, vector<1x1x2x128xf32>
    %54 = vector.shape_cast %53 : vector<1x1x2x128xf32> to vector<2x128xf32>
    %c0_33 = arith.constant 0 : index
    %c2_34 = arith.constant 2 : index
    %c0_35 = arith.constant 0 : index
    %c0_36 = arith.constant 0 : index
    %55 = vector.load %arg3[%c0_33, %c2_34, %c0_35, %c0_36] : memref<1x4x2x128xf32, #tpu.memory_space<vmem>>, vector<1x1x2x128xf32>
    %56 = vector.shape_cast %55 : vector<1x1x2x128xf32> to vector<2x128xf32>
    %c0_37 = arith.constant 0 : index
    %c2_38 = arith.constant 2 : index
    %c0_39 = arith.constant 0 : index
    %c0_40 = arith.constant 0 : index
    %57 = vector.load %arg4[%c0_37, %c2_38, %c0_39, %c0_40] : memref<1x4x2x128xf32, #tpu.memory_space<vmem>>, vector<1x1x2x128xf32>
    %58 = vector.shape_cast %57 : vector<1x1x2x128xf32> to vector<2x128xf32>
    %c0_41 = arith.constant 0 : index
    %c2_42 = arith.constant 2 : index
    %c0_43 = arith.constant 0 : index
    %c0_44 = arith.constant 0 : index
    %59 = vector.load %arg5[%c0_41, %c2_42, %c0_43, %c0_44] : memref<1x4x2x128xf32, #tpu.memory_space<vmem>>, vector<1x1x2x128xf32>
    %60 = vector.shape_cast %59 : vector<1x1x2x128xf32> to vector<2x128xf32>
    %61 = arith.mulf %54, %54 : vector<2x128xf32>
    %62 = arith.addf %36, %61 : vector<2x128xf32>
    %63 = arith.mulf %56, %56 : vector<2x128xf32>
    %64 = arith.addf %38, %63 : vector<2x128xf32>
    %65 = arith.mulf %58, %58 : vector<2x128xf32>
    %66 = arith.addf %40, %65 : vector<2x128xf32>
    %67 = arith.mulf %60, %60 : vector<2x128xf32>
    %68 = arith.addf %42, %67 : vector<2x128xf32>
    %69 = arith.mulf %54, %56 : vector<2x128xf32>
    %70 = arith.addf %44, %69 : vector<2x128xf32>
    %71 = arith.mulf %58, %60 : vector<2x128xf32>
    %72 = arith.addf %46, %71 : vector<2x128xf32>
    %73 = arith.mulf %54, %58 : vector<2x128xf32>
    %74 = arith.addf %48, %73 : vector<2x128xf32>
    %75 = arith.mulf %54, %60 : vector<2x128xf32>
    %76 = arith.addf %50, %75 : vector<2x128xf32>
    %77 = arith.mulf %58, %56 : vector<2x128xf32>
    %78 = arith.addf %52, %77 : vector<2x128xf32>
    %c0_45 = arith.constant 0 : index
    %c3 = arith.constant 3 : index
    %c0_46 = arith.constant 0 : index
    %c0_47 = arith.constant 0 : index
    %79 = vector.load %arg2[%c0_45, %c3, %c0_46, %c0_47] : memref<1x4x2x128xf32, #tpu.memory_space<vmem>>, vector<1x1x2x128xf32>
    %80 = vector.shape_cast %79 : vector<1x1x2x128xf32> to vector<2x128xf32>
    %c0_48 = arith.constant 0 : index
    %c3_49 = arith.constant 3 : index
    %c0_50 = arith.constant 0 : index
    %c0_51 = arith.constant 0 : index
    %81 = vector.load %arg3[%c0_48, %c3_49, %c0_50, %c0_51] : memref<1x4x2x128xf32, #tpu.memory_space<vmem>>, vector<1x1x2x128xf32>
    %82 = vector.shape_cast %81 : vector<1x1x2x128xf32> to vector<2x128xf32>
    %c0_52 = arith.constant 0 : index
    %c3_53 = arith.constant 3 : index
    %c0_54 = arith.constant 0 : index
    %c0_55 = arith.constant 0 : index
    %83 = vector.load %arg4[%c0_52, %c3_53, %c0_54, %c0_55] : memref<1x4x2x128xf32, #tpu.memory_space<vmem>>, vector<1x1x2x128xf32>
    %84 = vector.shape_cast %83 : vector<1x1x2x128xf32> to vector<2x128xf32>
    %c0_56 = arith.constant 0 : index
    %c3_57 = arith.constant 3 : index
    %c0_58 = arith.constant 0 : index
    %c0_59 = arith.constant 0 : index
    %85 = vector.load %arg5[%c0_56, %c3_57, %c0_58, %c0_59] : memref<1x4x2x128xf32, #tpu.memory_space<vmem>>, vector<1x1x2x128xf32>
    %86 = vector.shape_cast %85 : vector<1x1x2x128xf32> to vector<2x128xf32>
    %87 = arith.mulf %80, %80 : vector<2x128xf32>
    %88 = arith.addf %62, %87 : vector<2x128xf32>
    %89 = arith.mulf %82, %82 : vector<2x128xf32>
    %90 = arith.addf %64, %89 : vector<2x128xf32>
    %91 = arith.mulf %84, %84 : vector<2x128xf32>
    %92 = arith.addf %66, %91 : vector<2x128xf32>
    %93 = arith.mulf %86, %86 : vector<2x128xf32>
    %94 = arith.addf %68, %93 : vector<2x128xf32>
    %95 = arith.mulf %80, %82 : vector<2x128xf32>
    %96 = arith.addf %70, %95 : vector<2x128xf32>
    %97 = arith.mulf %84, %86 : vector<2x128xf32>
    %98 = arith.addf %72, %97 : vector<2x128xf32>
    %99 = arith.mulf %80, %84 : vector<2x128xf32>
    %100 = arith.addf %74, %99 : vector<2x128xf32>
    %101 = arith.mulf %80, %86 : vector<2x128xf32>
    %102 = arith.addf %76, %101 : vector<2x128xf32>
    %103 = arith.mulf %84, %82 : vector<2x128xf32>
    %104 = arith.addf %78, %103 : vector<2x128xf32>
    %cst_60 = arith.constant 1.000000e-16 : f32
    %105 = vector.broadcast %cst_60 : f32 to vector<2x128xf32>
    %106 = arith.maximumf %88, %105 : vector<2x128xf32>
    %107 = math.rsqrt %106 : vector<2x128xf32>
    %cst_61 = arith.constant 1.000000e-16 : f32
    %108 = vector.broadcast %cst_61 : f32 to vector<2x128xf32>
    %109 = arith.maximumf %90, %108 : vector<2x128xf32>
    %110 = math.rsqrt %109 : vector<2x128xf32>
    %cst_62 = arith.constant 1.000000e-16 : f32
    %111 = vector.broadcast %cst_62 : f32 to vector<2x128xf32>
    %112 = arith.maximumf %92, %111 : vector<2x128xf32>
    %113 = math.rsqrt %112 : vector<2x128xf32>
    %cst_63 = arith.constant 1.000000e-16 : f32
    %114 = vector.broadcast %cst_63 : f32 to vector<2x128xf32>
    %115 = arith.maximumf %94, %114 : vector<2x128xf32>
    %116 = math.rsqrt %115 : vector<2x128xf32>
    %117 = math.absf %96 : vector<2x128xf32>
    %118 = arith.mulf %107, %110 : vector<2x128xf32>
    %119 = arith.mulf %117, %118 : vector<2x128xf32>
    %cst_64 = arith.constant 1.000000e+00 : f32
    %120 = vector.broadcast %cst_64 : f32 to vector<2x128xf32>
    %121 = arith.subf %120, %119 : vector<2x128xf32>
    %122 = math.absf %98 : vector<2x128xf32>
    %123 = arith.mulf %113, %116 : vector<2x128xf32>
    %124 = arith.mulf %122, %123 : vector<2x128xf32>
    %cst_65 = arith.constant 1.000000e+00 : f32
    %125 = vector.broadcast %cst_65 : f32 to vector<2x128xf32>
    %126 = arith.subf %125, %124 : vector<2x128xf32>
    %127 = arith.addf %121, %126 : vector<2x128xf32>
    %128 = math.absf %100 : vector<2x128xf32>
    %129 = arith.mulf %107, %113 : vector<2x128xf32>
    %130 = arith.mulf %128, %129 : vector<2x128xf32>
    %131 = math.absf %102 : vector<2x128xf32>
    %132 = arith.mulf %107, %116 : vector<2x128xf32>
    %133 = arith.mulf %131, %132 : vector<2x128xf32>
    %134 = arith.addf %130, %133 : vector<2x128xf32>
    %135 = math.absf %104 : vector<2x128xf32>
    %136 = arith.mulf %113, %110 : vector<2x128xf32>
    %137 = arith.mulf %135, %136 : vector<2x128xf32>
    %138 = arith.addf %134, %137 : vector<2x128xf32>
    %cst_66 = arith.constant 5.000000e-01 : f32
    %139 = vector.broadcast %cst_66 : f32 to vector<2x128xf32>
    %140 = arith.mulf %139, %138 : vector<2x128xf32>
    %141 = arith.addf %127, %140 : vector<2x128xf32>
    %c0_67 = arith.constant 0 : index
    %c0_68 = arith.constant 0 : index
    %c0_69 = arith.constant 0 : index
    %142 = vector.load %arg6[%c0_67, %c0_68, %c0_69] : memref<1x2x128xf32, #tpu.memory_space<vmem>>, vector<1x2x128xf32>
    %143 = vector.shape_cast %142 : vector<1x2x128xf32> to vector<2x128xf32>
    %144 = vector.shape_cast %141 : vector<2x128xf32> to vector<1x2x128xf32>
    tpu.vector_store %arg6[%c0_67, %c0_68, %c0_69], %144 {strides = array<i32>} : memref<1x2x128xf32, #tpu.memory_space<vmem>>, vector<1x2x128xf32>,
    return
  }
  func.func @transform_0(%arg0: i32, %arg1: i32) -> (i32, i32, i32, i32) {
    %c0_i32 = arith.constant 0 : i32
    %c0_i32_0 = arith.constant 0 : i32
    %c0_i32_1 = arith.constant 0 : i32
    return %arg0, %c0_i32, %arg1, %c0_i32_0 : i32, i32, i32, i32
  }
  func.func @transform_1(%arg0: i32, %arg1: i32) -> (i32, i32, i32, i32) {
    %c0_i32 = arith.constant 0 : i32
    %c0_i32_0 = arith.constant 0 : i32
    %c0_i32_1 = arith.constant 0 : i32
    return %arg0, %c0_i32, %arg1, %c0_i32_0 : i32, i32, i32, i32
  }
  func.func @transform_2(%arg0: i32, %arg1: i32) -> (i32, i32, i32, i32) {
    %c0_i32 = arith.constant 0 : i32
    %c0_i32_0 = arith.constant 0 : i32
    %c0_i32_1 = arith.constant 0 : i32
    return %arg0, %c0_i32, %arg1, %c0_i32_0 : i32, i32, i32, i32
  }
  func.func @transform_3(%arg0: i32, %arg1: i32) -> (i32, i32, i32, i32) {
    %c0_i32 = arith.constant 0 : i32
    %c0_i32_0 = arith.constant 0 : i32
    %c0_i32_1 = arith.constant 0 : i32
    return %arg0, %c0_i32, %arg1, %c0_i32_0 : i32, i32, i32, i32
  }
  func.func @transform_4(%arg0: i32, %arg1: i32) -> (i32, i32, i32) {
    %c0_i32 = arith.constant 0 : i32
    %c0_i32_0 = arith.constant 0 : i32
    return %arg0, %arg1, %c0_i32 : i32, i32, i32
  }
}

</mosaic_0001>

<bundles_post_ra>
// kernel: tpu_custom_call.1
= control target key start
LH: loop header
LB: loop body
LE: loop exit
PB: predicated region body
PF: predicated region fallthrough
CT: control target
= control target key end

     0   :  { %s1372_s0 = inlined_call_operand.hbm [shape: f32[2,4,2,128], index: 0, kind: input, shape index: {}]   ;;  %s1373_s1 = inlined_call_operand.hbm [shape: f32[2,4,2,128], index: 1, kind: input, shape index: {}]   ;;  %s1374_s2 = inlined_call_operand.hbm [shape: f32[2,4,2,128], index: 2, kind: input, shape index: {}]   ;;  %s1375_s3 = inlined_call_operand.hbm [shape: f32[2,4,2,128], index: 3, kind: input, shape index: {}]   ;;  %s1376_s4 = inlined_call_operand.hbm [shape: f32[2,2,128], index: 4, kind: output, shape index: {}]  }
   0x1   :  { %1388 = sst [smem:[#allocation20_spill]] %s1372_s0 }
   0x2   :  { %1389 = sst [smem:[#allocation21_spill]] %s1373_s1 }
   0x3   :  { %9 = vsyncpa [#allocation3], 0 }
   0x4   :  { %11 = vsyncpa [#allocation3 + $0x1], 0 }
   0x5   :  { %12 = vsyncpa [#allocation6], 0 }
   0x6   :  { %14 = vsyncpa [#allocation6 + $0x1], 0 }
   0x7   :  { %15 = vsyncpa [#allocation9], 0 }
   0x8   :  { %17 = vsyncpa [#allocation9 + $0x1], 0 }
   0x9   :  { %18 = vsyncpa [#allocation4], 0 }
   0xa   :  { %20 = vsyncpa [#allocation4 + $0x1], 0  ;;  %s1031_s15 = smov 0   ;;  %s1033_s16 = smov 0  }
   0xb   :  { %s1035_s17 = smov 0   ;;  %s1037_s18 = smov 0  }
   0xc   :  { %s1039_s19 = smov 0   ;;  %s1041_s20 = smov 0  }
   0xd LB: > { %1390 = sst [smem:[#allocation15_spill]] %s985_s17  ;;  %s1062_s21 = sadd.s32 4294967295, %s997_s20   ;;  %s997_s20 = sphi %s1041_s20, %s26_s20   ;;  %s993_s19 = sphi %s1039_s19, %s1417_s19   ;;  %s989_s18 = sphi %s1037_s18, %s1416_s18   ;;  %s985_s17 = sphi %s1035_s17, %s1415_s17   ;;  %s981_s16 = sphi %s1033_s16, %s1419_s16   ;;  %s977_s15 = sphi %s1031_s15, %s1418_s15  }
   0xe   : > { %1391 = sst [smem:[#allocation16_spill]] %s993_s19  ;;  %s659_s22 = sadd.s32 4294967294, %s997_s20  }
   0xf   : > { %1392 = sst [smem:[#allocation17_spill]] %s997_s20  ;;  %s38_s23 = sadd.s32 1, %s993_s19 }
  0x10   : > { %s47_s24 = sadd.s32 1, %s985_s17  ;;  %p40_p0 = scmp.ge.s32.totalorder %s38_s23, 2 }
  0x11   : > { %p54_p1 = scmp.ne.s32.totalorder %s985_s17, %s981_s16  ;;  %p55_p2 = scmp.eq.s32.totalorder %s997_s20, 0 }
  0x12   : > { %p60_p3 = scmp.ne.s32.totalorder %s981_s16, %s977_s15  ;;  %s1421_s23 = smov (%p40_p0, %s38_s23), 0 }
  0x13   : > { %1393 = sst [smem:[#allocation18_spill]] %s1421_s23  ;;  %p1074_p4 = por %p55_p2, %p54_p1 }
  0x14   : > { %p61_p5 = scmp.eq.s32.totalorder %s1062_s21, 0  ;;  %s42_s26 = ssub.s32 %s993_s19, %s1421_s23 }
  0x15   : > { %p170_p6 = scmp.eq.s32.totalorder %s1062_s21, 1  ;;  %p45_p7 = scmp.eq.s32.totalorder %s42_s26, 0 }
  0x16   : > { %p1082_p8 = por %p61_p5, %p60_p3  ;;  %p176_p10 = scmp.eq.s32.totalorder %s659_s22, 1 }
  0x17   : > { %p1086_p9 = por %p170_p6, %p54_p1  ;;  %p727_p13 = scmp.lt.s32.totalorder %s997_s20, 2 }
  0x18   : > { %s1395_s27 = scalar_select %p1082_p8, 1, 0 }
  0x19   : > { %s1396_s28 = scalar_select %p1086_p9, 1, 0 }
  0x1a   : > { %s1091_s29 = scalar_select %p45_p7, %s985_s17, %s47_s24  }
  0x1b   : > { %p1093_p11 = por %p176_p10, %p60_p3  ;;  %s1100_s5 = sand.u32 1, %s985_s17  }
  0x1c   : > { %1397 = sst [smem:[#allocation19_spill]] %s1091_s29  ;;  %s1103_s6 = sshll.u32 %s1100_s5, 3 }
  0x1d   : > { %s1398_s30 = scalar_select %p1093_p11, 1, 0 }
  0x1e   : > { %s1106_s7 = sshll.u32 %s993_s19, 7  ;;  %p1110_p0 = pnand %p727_p13, %p1074_p4 }
  0x1f   : > { %s218_s9 = sand.u32 1, %s997_s20   ;;  %s1400_s1 = sld [smem:[#allocation21_spill]] }
  0x20   : > { %s222_s13 = scalar_lea.vmem [#allocation5], %s1103_s6  ;;  %s1126_s22 = scalar_lea.sflag [#allocation6], %s218_s9 }
  0x21   : > { %s230_s14 = sshll.u32 %s222_s13, 4  ;;  %p1132_p4 = pneg %p1110_p0  ;;  %s1123_s14 = int_to_ptr.vmem [resolvable:$true] %s230_s14 }
  0x25   : > { %s1119_s12 = scalar_lea.hbm %s1400_s1, %s1106_s7  ;;  %s792_s11 = scalar_lea.hbm %s1400_s1, 256 }
  0x26   : > { %s787_s24 = scalar_lea.hbm %s1119_s12, 128  ;;  %p793_p7 = scmp.lt.u32.totalorder %s1119_s12, %s1400_s1 }
  0x27   : > { %p788_p3 = scmp.ne.s32.totalorder %s1119_s12, %s787_s24  ;;  %p794_p10 = scmp.lt.u32.totalorder %s792_s11, %s787_s24 }
  0x28   : > { %p796_p12 = scmp.lt.u32.totalorder %s787_s24, %s1119_s12 }
  0x29   : > { %p790_p5 = pnand %p1132_p4, %p788_p3  ;;  %p795_p13 = por %p794_p10, %p793_p7 }
  0x2b   : > { %p791_p6 = pneg %p790_p5  ;;  %p797_p1 = por %p796_p12, %p795_p13 }
  0x2d   : > { %p798_p2 = pnand %p797_p1, %p791_p6 }
  0x2f   : > { %801 = shalt.err (!%p798_p2)
}
  0x30   : > { %s802_s9 = scalar_lea.vmem %s1123_s14, 128  ;;  %s999_s26 = smov [#allocation5]  }
  0x31   : > { %p803_p3 = scmp.ne.s32.totalorder %s1123_s14, %s802_s9  ;;  %s807_s10 = sshll.u32 %s999_s26, 4  ;;  %s808_s10 = int_to_ptr.vmem [resolvable:$false] %s807_s10 }
  0x32   : > { %s809_s23 = scalar_lea.vmem %s808_s10, 256  ;;  %p810_p9 = scmp.lt.s32.totalorder %s1123_s14, %s808_s10 }
  0x33   : > { %p805_p5 = pnand %p803_p3, %p1132_p4  ;;  %p811_p8 = scmp.lt.s32.totalorder %s809_s23, %s802_s9 }
  0x35   : > { %p806_p11 = pneg %p805_p5  ;;  %p812_p7 = por %p811_p8, %p810_p9 }
  0x37   : > { %p813_p10 = pnand %p812_p7, %p806_p11 }
  0x39   : > { %816 = shalt.err (!%p813_p10)
}
  0x3a   : > { %s1380_s24 = smov 32   ;;  %s1382_s11 = smov 2  }
  0x3b   : > { %716 = dma.hbm_to_vmem [thread:$0]  (!%p1110_p0), %s1119_s12, 128, %s1123_s14, %s1126_s22, %s1380_s24, %s1380_s24, %s1382_s11  }
  0x3c   : > { %p1402_p8 = scmp.lt.s32.totalorder %s997_s20, 3  ;;  %p1403_p9 = scmp.ge.s32.totalorder %s997_s20, 1 }
  0x3d   : > { %s1405_s0 = sld [smem:[#allocation20_spill]]  ;;  %s200_s23 = scalar_lea.vmem [#allocation2], %s1103_s6 }
  0x3e   : > { %p1163_p11 = pnand %p1403_p9, %p1402_p8  ;;  %s208_s1 = sshll.u32 %s200_s23, 4  ;;  %s1174_s1 = int_to_ptr.vmem [resolvable:$true] %s208_s1 }
  0x3f   : > { %s1180_s24 = scalar_lea.hbm %s1374_s2, %s1106_s7  ;;  %s197_s11 = scalar_lea.sflag [#allocation3], %s1100_s5 }
  0x40   : > { %s1404_s13 = scalar_select %p1163_p11, 1, 0 }
  0x43   : > { %s1171_s10 = scalar_lea.hbm %s1405_s0, %s1106_s7  ;;  %s822_s29 = scalar_lea.hbm %s1405_s0, 256 }
  0x44   : > { %s817_s19 = scalar_lea.hbm %s1171_s10, 128  ;;  %p823_p6 = scmp.lt.u32.totalorder %s1171_s10, %s1405_s0 }
  0x45   : > { %p818_p12 = scmp.ne.s32.totalorder %s1171_s10, %s817_s19  ;;  %p824_p13 = scmp.lt.u32.totalorder %s822_s29, %s817_s19 }
  0x46   : > { %p826_p5 = scmp.lt.u32.totalorder %s817_s19, %s1171_s10 }
  0x47   : > { %p820_p1 = pnand %p818_p12, %p1132_p4  ;;  %p825_p3 = por %p824_p13, %p823_p6 }
  0x49   : > { %p821_p2 = pneg %p820_p1  ;;  %p827_p7 = por %p826_p5, %p825_p3 }
  0x4b   : > { %p828_p10 = pnand %p827_p7, %p821_p2 }
  0x4d   : > { %831 = shalt.err (!%p828_p10)
}
  0x4e   : > { %s832_s23 = scalar_lea.vmem %s1174_s1, 128  ;;  %s1002_s12 = smov [#allocation2]  }
  0x4f   : > { %p833_p8 = scmp.ne.s32.totalorder %s1174_s1, %s832_s23  ;;  %s837_s14 = sshll.u32 %s1002_s12, 4  ;;  %s838_s14 = int_to_ptr.vmem [resolvable:$false] %s837_s14 }
  0x50   : > { %s839_s17 = scalar_lea.vmem %s838_s14, 256  ;;  %p840_p1 = scmp.lt.s32.totalorder %s1174_s1, %s838_s14 }
  0x51   : > { %p835_p9 = pnand %p833_p8, %p1132_p4  ;;  %p841_p11 = scmp.lt.s32.totalorder %s839_s17, %s832_s23 }
  0x53   : > { %p836_p12 = pneg %p835_p9  ;;  %p842_p6 = por %p841_p11, %p840_p1 }
  0x55   : > { %p843_p13 = pnand %p842_p6, %p836_p12 }
  0x57   : > { %846 = shalt.err (!%p843_p13)
}
  0x58   : > { %s1406_s19 = smov 2   ;;  %s1407_s20 = smov 32  }
  0x59   : > { %713 = dma.hbm_to_vmem [thread:$0]  (!%p1110_p0), %s1171_s10, 128, %s1174_s1, %s197_s11, %s1407_s20, %s1407_s20, %s1406_s19  }
  0x5a   : > { %s244_s29 = scalar_lea.vmem [#allocation7], %s1103_s6  ;;  %s847_s26 = scalar_lea.hbm %s1180_s24, 128 }
  0x5b   : > { %s252_s9 = sshll.u32 %s244_s29, 4  ;;  %p848_p11 = scmp.ne.s32.totalorder %s1180_s24, %s847_s26  ;;  %s1210_s9 = int_to_ptr.vmem [resolvable:$true] %s252_s9 }
  0x5c   : > { %s852_s14 = scalar_lea.hbm %s1374_s2, 256  ;;  %p853_p5 = scmp.lt.u32.totalorder %s1180_s24, %s1374_s2 }
  0x5d   : > { %p850_p2 = pnand %p848_p11, %p1132_p4  ;;  %p854_p7 = scmp.lt.u32.totalorder %s852_s14, %s847_s26 }
  0x5e   : > { %p856_p8 = scmp.lt.u32.totalorder %s847_s26, %s1180_s24 }
  0x5f   : > { %p851_p3 = pneg %p850_p2  ;;  %p855_p10 = por %p854_p7, %p853_p5 }
  0x61   : > { %p857_p9 = por %p856_p8, %p855_p10 }
  0x63   : > { %p858_p12 = pnand %p857_p9, %p851_p3 }
  0x65   : > { %861 = shalt.err (!%p858_p12)
}
  0x66   : > { %s862_s1 = scalar_lea.vmem %s1210_s9, 128  ;;  %s1003_s11 = smov [#allocation7]  }
  0x67   : > { %p863_p1 = scmp.ne.s32.totalorder %s1210_s9, %s862_s1  ;;  %s867_s10 = sshll.u32 %s1003_s11, 4  ;;  %s868_s10 = int_to_ptr.vmem [resolvable:$false] %s867_s10 }
  0x68   : > { %s869_s0 = scalar_lea.vmem %s868_s10, 256  ;;  %p870_p11 = scmp.lt.s32.totalorder %s1210_s9, %s868_s10 }
  0x69   : > { %p865_p6 = pnand %p863_p1, %p1132_p4  ;;  %p871_p2 = scmp.lt.s32.totalorder %s869_s0, %s862_s1 }
  0x6b   : > { %p866_p13 = pneg %p865_p6  ;;  %p872_p5 = por %p871_p2, %p870_p11 }
  0x6d   : > { %p873_p7 = pnand %p872_p5, %p866_p13 }
  0x6f   : > { %876 = shalt.err (!%p873_p7)
}
  0x70   : > { %719 = dma.hbm_to_vmem [thread:$0]  (!%p1110_p0), %s1180_s24, 128, %s1210_s9, %s1126_s22, %s1407_s20, %s1407_s20, %s1406_s19  }
  0x71   : > { %s1241_s23 = scalar_lea.hbm %s1375_s3, %s1106_s7  ;;  %s266_s12 = scalar_lea.vmem [#allocation8], %s1103_s6 }
  0x72   : > { %s274_s14 = sshll.u32 %s266_s12, 4  ;;  %s263_s17 = scalar_lea.sflag [#allocation9], %s1100_s5  ;;  %s1244_s14 = int_to_ptr.vmem [resolvable:$true] %s274_s14 }
  0x73   : > { %s877_s1 = scalar_lea.hbm %s1241_s23, 128  ;;  %s882_s9 = scalar_lea.hbm %s1375_s3, 256 }
  0x74   : > { %p878_p3 = scmp.ne.s32.totalorder %s1241_s23, %s877_s1  ;;  %p883_p9 = scmp.lt.u32.totalorder %s1241_s23, %s1375_s3 }
  0x75   : > { %p884_p12 = scmp.lt.u32.totalorder %s882_s9, %s877_s1  ;;  %p886_p6 = scmp.lt.u32.totalorder %s877_s1, %s1241_s23 }
  0x76   : > { %p880_p10 = pnand %p878_p3, %p1132_p4 }
  0x77   : > { %p885_p1 = por %p884_p12, %p883_p9 }
  0x78   : > { %p881_p8 = pneg %p880_p10 }
  0x79   : > { %p887_p13 = por %p886_p6, %p885_p1 }
  0x7b   : > { %p888_p11 = pnand %p887_p13, %p881_p8 }
  0x7d   : > { %891 = shalt.err (!%p888_p11)
}
  0x7e   : > { %s892_s6 = scalar_lea.vmem %s1244_s14, 128  ;;  %s1004_s10 = smov [#allocation8]  }
  0x7f   : > { %p893_p2 = scmp.ne.s32.totalorder %s1244_s14, %s892_s6  ;;  %s897_s0 = sshll.u32 %s1004_s10, 4  ;;  %s898_s0 = int_to_ptr.vmem [resolvable:$false] %s897_s0 }
  0x80   : > { %s899_s29 = scalar_lea.vmem %s898_s0, 256  ;;  %p900_p3 = scmp.lt.s32.totalorder %s1244_s14, %s898_s0 }
  0x81   : > { %p895_p5 = pnand %p893_p2, %p1132_p4  ;;  %p901_p10 = scmp.lt.s32.totalorder %s899_s29, %s892_s6 }
  0x83   : > { %p896_p7 = pneg %p895_p5  ;;  %p902_p9 = por %p901_p10, %p900_p3 }
  0x85   : > { %p903_p12 = pnand %p902_p9, %p896_p7 }
  0x87   : > { %906 = shalt.err (!%p903_p12)
}
  0x88   : > { %722 = dma.hbm_to_vmem [thread:$0]  (!%p1110_p0), %s1241_s23, 128, %s1244_s14, %s263_s17, %s1407_s20, %s1407_s20, %s1406_s19  }
  0x89   : > { %p1408_p4 = scmp.ne.s32.totalorder %s1404_s13, 0 }
  0x8a   : > { %s1276_s25 = sand.u32 (!%p1408_p4), 1, %s981_s16   ;;  %p1409_p8 = scmp.ne.s32.totalorder (!%p1408_p4), %s1395_s27, 0 }
  0x8b   : > { %286 = sbr.rel (%p1408_p4) target bundleno = 207 (0xcf), region = 36  ;;  %s675_s26 = sshll.u32 (!%p1408_p4), %s1276_s25, 3 }
  0x8c   : > { %s289_s12 = scalar_lea.sflag (!%p1408_p4), [#allocation3], %s1276_s25  ;;  %s1280_s8 = scalar_lea.vmem (!%p1408_p4), [#allocation2], %s675_s26 }
  0x92   : > { %960 = dma.done.wait (%p1409_p8), %s289_s12, 128  }
  0x93   : > { %962 = vsyncadd (%p1409_p8), %s289_s12, 4294967168  ;;  %s297_s5 = sand.u32 1, %s1062_s21   ;;  %s1287_s19 = scalar_lea.vmem [#allocation5], %s675_s26 }
  0x94   : > { %s298_s13 = scalar_lea.sflag [#allocation6], %s297_s5 }
  0x95   : > { %964 = dma.done.wait (%p1409_p8), %s298_s13, 256  }
  0x96   : > { %966 = vsyncadd (%p1409_p8), %s298_s13, 4294967040  ;;  %s1293_s20 = scalar_lea.vmem [#allocation7], %s675_s26  ;;  %s316_s23 = scalar_lea.sflag [#allocation9], %s1276_s25 }
  0x97   : > { %s1296_s14 = scalar_lea.vmem [#allocation8], %s675_s26 }
  0x98   : > { %968 = dma.done.wait (%p1409_p8), %s316_s23, 128  }
  0x99   : > { %970 = vsyncadd (%p1409_p8), %s316_s23, 4294967168  ;;  %v359_v0 = vld [vmem:[%s1280_s8] sm:$0x3]  ;;  %v360_v1 = vld [vmem:[%s1287_s19] sm:$0x3]  ;;  %s679_s21 = sshll.u32 %s1276_s25, 1 }
  0x9a   : > { %v361_v2 = vld [vmem:[%s1293_s20] sm:$0x3]  ;;  %v362_v3 = vld [vmem:[%s1296_s14] sm:$0x3]  ;;  %v363_v4 = vmul.f32 %v359_v0, %v359_v0  ;;  %v680_v5 = vld [vmem:[%s1280_s8 + $0x2] sm:$0x3]  ;;  %v365_v7 = vmul.f32 %v360_v1, %v360_v1  ;;  %v371_v29 = vmul.f32 %v360_v1, %v359_v0 }
  0x9b   : > { %v681_v6 = vld [vmem:[%s1287_s19 + $0x2] sm:$0x3]  ;;  %v367_v8 = vmul.f32 %v361_v2, %v361_v2  ;;  %v369_v9 = vmul.f32 %v362_v3, %v362_v3  ;;  %v682_v10 = vld [vmem:[%s1293_s20 + $0x2] sm:$0x3]  ;;  %v389_v12 = vmul.f32 %v680_v5, %v680_v5  ;;  %v684_v16 = vld [vmem:[%s1280_s8 + $0x4] sm:$0x3]  ;;  %v373_v30 = vmul.f32 %v362_v3, %v361_v2 }
  0x9c   : > { %v683_v11 = vld [vmem:[%s1296_s14 + $0x2] sm:$0x3]  ;;  %v391_v13 = vmul.f32 %v681_v6, %v681_v6  ;;  %v393_v14 = vmul.f32 %v682_v10, %v682_v10  ;;  %v685_v17 = vld [vmem:[%s1287_s19 + $0x4] sm:$0x3]  ;;  %v686_v19 = vld [vmem:[%s1293_s20 + $0x4] sm:$0x3]  ;;  %v415_v24 = vmul.f32 %v684_v16, %v684_v16  ;;  %v375_v35 = vmul.f32 %v361_v2, %v359_v0 }
  0x9d   : > { %v395_v15 = vmul.f32 %v683_v11, %v683_v11  ;;  %v390_v18 = vadd.f32 %v389_v12, %v363_v4  ;;  %v687_v20 = vld [vmem:[%s1296_s14 + $0x4] sm:$0x3]  ;;  %v417_v25 = vmul.f32 %v685_v17, %v685_v17  ;;  %v419_v26 = vmul.f32 %v686_v19, %v686_v19  ;;  %v688_v28 = vld [vmem:[%s1280_s8 + $0x6] sm:$0x3]  ;;  %v689_v32 = vld [vmem:[%s1287_s19 + $0x6] sm:$0x3] }
  0x9e   : > { %v392_v21 = vadd.f32 %v391_v13, %v365_v7  ;;  %v394_v22 = vadd.f32 %v393_v14, %v367_v8  ;;  %v421_v27 = vmul.f32 %v687_v20, %v687_v20  ;;  %v690_v33 = vld [vmem:[%s1293_s20 + $0x6] sm:$0x3]  ;;  %v691_v34 = vld [vmem:[%s1296_s14 + $0x6] sm:$0x3]  ;;  %v397_v39 = vmul.f32 %v681_v6, %v680_v5  ;;  %s358_s27 = scalar_lea.vmem [#allocation10], %s679_s21  ;;  %s693_s1 = sshll.u32 %s989_s18, 5 }
  0x9f   : > { %v396_v23 = vadd.f32 %v395_v15, %v369_v9  ;;  %v416_v31 = vadd.f32 %v415_v24, %v390_v18  ;;  %v399_v40 = vmul.f32 %v683_v11, %v682_v10  ;;  %v401_v41 = vmul.f32 %v682_v10, %v680_v5  ;;  %s505_s17 = sshll.u32 %s358_s27, 4  ;;  %s1325_s9 = scalar_lea.hbm %s1376_s4, %s693_s1  ;;  %s1320_s17 = int_to_ptr.vmem [resolvable:$true] %s505_s17 }
  0xa0   : > { %v418_v36 = vadd.f32 %v417_v25, %v392_v21  ;;  %v420_v37 = vadd.f32 %v419_v26, %v394_v22  ;;  %v441_v42 = vmul.f32 %v688_v28, %v688_v28  ;;  %v443_v43 = vmul.f32 %v689_v32, %v689_v32  ;;  %s491_s7 = scalar_lea.sflag [#allocation4], %s1276_s25  ;;  %s907_s11 = scalar_lea.vmem %s1320_s17, 32 }
  0xa1   : > { %v422_v38 = vadd.f32 %v421_v27, %v396_v23  ;;  %v445_v44 = vmul.f32 %v690_v33, %v690_v33  ;;  %v447_v45 = vmul.f32 %v691_v34, %v691_v34  ;;  %v377_v46 = vmul.f32 %v362_v3, %v359_v0  ;;  %p908_p0 = scmp.ne.s32.totalorder %s1320_s17, %s907_s11  ;;  %p1410_p1 = scmp.ne.s32.totalorder %s1396_s28, 0 }
  0xa2   : > { %v379_v47 = vmul.f32 %v361_v2, %v360_v1  ;;  %v403_v48 = vmul.f32 %v683_v11, %v680_v5  ;;  %v442_v49 = vadd.f32 %v441_v42, %v416_v31  ;;  %v405_v50 = vmul.f32 %v682_v10, %v681_v6  ;;  %s1005_s18 = smov [#allocation10]  }
  0xa3   : > { %v444_v51 = vadd.f32 %v443_v43, %v418_v36  ;;  %v446_v52 = vadd.f32 %v445_v44, %v420_v37  ;;  %v448_v53 = vadd.f32 %v447_v45, %v422_v38  ;;  %v398_v54 = vadd.f32 %v397_v39, %v371_v29  ;;  %p909_p6 = pnand %p908_p0, %p1410_p1  ;;  %s911_s6 = sshll.u32 %s1005_s18, 4  ;;  %s912_s6 = int_to_ptr.vmem [resolvable:$false] %s911_s6 }
  0xa4   : > { %v400_v55 = vadd.f32 %v399_v40, %v373_v30  ;;  %v402_v56 = vadd.f32 %v401_v41, %v375_v35  ;;  %v423_v57 = vmul.f32 %v685_v17, %v684_v16  ;;  %v425_v58 = vmul.f32 %v687_v20, %v686_v19  ;;  %s913_s10 = scalar_lea.vmem %s912_s6, 64  ;;  %p914_p11 = scmp.lt.s32.totalorder %s1320_s17, %s912_s6 }
  0xa5   : > { %v459_v59 = vmax.f32 %v442_v49, 1e-16  ;;  %v461_v60 = vmax.f32 %v444_v51, 1e-16  ;;  %v463_v61 = vmax.f32 %v446_v52, 1e-16  ;;  %v404_v62 = vadd.f32 %v403_v48, %v377_v46  ;;  %p910_p13 = pneg %p909_p6  ;;  %p915_p2 = scmp.lt.s32.totalorder %s913_s10, %s907_s11 }
  0xa6   : > { %v427_v63 = vmul.f32 %v686_v19, %v684_v16  ;;  %v429_v4 = vmul.f32 %v687_v20, %v684_v16  ;;  %v465_v7 = vmax.f32 %v448_v53, 1e-16  ;;  %v406_v0 = vadd.f32 %v405_v50, %v379_v47 }
  0xa7   : > { %v431_v1 = vmul.f32 %v686_v19, %v685_v17  ;;  %779 = vrsqrt.f32 %v459_v59  ;;  %v424_v2 = vadd.f32 %v423_v57, %v398_v54  ;;  %v426_v3 = vadd.f32 %v425_v58, %v400_v55  ;;  %p916_p5 = por %p915_p2, %p914_p11 }
  0xa8   : > { %781 = vrsqrt.f32 %v461_v60  ;;  %v449_v5 = vmul.f32 %v689_v32, %v688_v28  ;;  %v428_v6 = vadd.f32 %v427_v63, %v402_v56  ;;  %v430_v8 = vadd.f32 %v429_v4, %v404_v62 }
  0xa9   : > { %783 = vrsqrt.f32 %v463_v61  ;;  %v453_v9 = vmul.f32 %v690_v33, %v688_v28  ;;  %v432_v10 = vadd.f32 %v431_v1, %v406_v0  ;;  %v451_v11 = vmul.f32 %v691_v34, %v690_v33  ;;  %p917_p7 = pnand %p916_p5, %p910_p13 }
  0xaa   : > { %785 = vrsqrt.f32 %v465_v7  ;;  %v455_v12 = vmul.f32 %v691_v34, %v688_v28  ;;  %v457_v13 = vmul.f32 %v690_v33, %v689_v32  ;;  %v450_v14 = vadd.f32 %v449_v5, %v424_v2 }
  0xab   : > { %v454_v15 = vadd.f32 %v453_v9, %v428_v6  ;;  %v452_v16 = vadd.f32 %v451_v11, %v426_v3 }
  0xac   : > { %v456_v18 = vadd.f32 %v455_v12, %v430_v8  ;;  %v458_v20 = vadd.f32 %v457_v13, %v432_v10  ;;  %v467_v19 = vand.u32 2147483647, %v450_v14 }
  0xad   : > { %v476_v22 = vand.u32 2147483647, %v454_v15  ;;  %v471_v25 = vand.u32 2147483647, %v452_v16 }
  0xae   : > { %v479_v26 = vand.u32 2147483647, %v456_v18  ;;  %v483_v27 = vand.u32 2147483647, %v458_v20 }
  0xb1   : > { %v780_v17 = vpop.eup %779 }
  0xb2   : > { %v782_v21 = vpop.eup %781 }
  0xb3   : > { %v784_v23 = vpop.eup %783  ;;  %v468_v24 = vmul.f32 %v782_v21, %v780_v17 }
  0xb4   : > { %v786_v29 = vpop.eup %785  ;;  %v477_v30 = vmul.f32 %v784_v23, %v780_v17  ;;  %v484_v31 = vmul.f32 %v784_v23, %v782_v21 }
  0xb5   : > { %v469_v28 = vmul.f32 %v468_v24, %v467_v19  ;;  %v472_v32 = vmul.f32 %v786_v29, %v784_v23  ;;  %v480_v33 = vmul.f32 %v786_v29, %v780_v17 }
  0xb6   : > { %v478_v34 = vmul.f32 %v477_v30, %v476_v22  ;;  %v485_v38 = vmul.f32 %v484_v31, %v483_v27 }
  0xb7   : > { %v470_v35 = vsub.f32 1.0, %v469_v28  ;;  %v473_v36 = vmul.f32 %v472_v32, %v471_v25  ;;  %v481_v37 = vmul.f32 %v480_v33, %v479_v26 }
  0xb9   : > { %v474_v39 = vsub.f32 1.0, %v473_v36  ;;  %v482_v40 = vadd.f32 %v481_v37, %v478_v34 }
  0xbb   : > { %v475_v41 = vadd.f32 %v474_v39, %v470_v35  ;;  %v486_v42 = vadd.f32 %v485_v38, %v482_v40 }
  0xbd   : > { %v487_v43 = vmul.f32 0.5, %v486_v42 }
  0xbf   : > { %v488_v44 = vadd.f32 %v487_v43, %v475_v41 }
  0xc1   : > { %489 = vst [vmem:[%s358_s27] sm:$0x3] %v488_v44 }
  0xc2   : > { %920 = shalt.err (!%p917_p7)
}
  0xc3   : > { %s921_s0 = scalar_lea.hbm %s1325_s9, 32  ;;  %s925_s26 = scalar_lea.hbm %s1376_s4, 64 }
  0xc4   : > { %p922_p3 = scmp.ne.s32.totalorder %s1325_s9, %s921_s0  ;;  %p926_p12 = scmp.lt.u32.totalorder %s1325_s9, %s1376_s4 }
  0xc5   : > { %p927_p4 = scmp.lt.u32.totalorder %s925_s26, %s921_s0  ;;  %p929_p0 = scmp.lt.u32.totalorder %s921_s0, %s1325_s9 }
  0xc6   : > { %p923_p10 = pnand %p922_p3, %p1410_p1 }
  0xc7   : > { %p928_p8 = por %p927_p4, %p926_p12 }
  0xc8   : > { %p924_p9 = pneg %p923_p10 }
  0xc9   : > { %p930_p6 = por %p929_p0, %p928_p8 }
  0xcb   : > { %p931_p13 = pnand %p930_p6, %p924_p9 }
  0xcd   : > { %934 = shalt.err (!%p931_p13)
}
  0xce   : > { %708 = dma.vmem_to_hbm [thread:$0]  (%p1410_p1), %s1320_s17, 32, %s1325_s9, %s491_s7  }
  0xcf PF: > { %s1411_s5 = sld [smem:[#allocation17_spill]]  ;;  %s517_s13 = sand.u32 1, %s977_s15  }
  0xd0   : > { %p1412_p11 = scmp.ne.s32.totalorder %s1398_s30, 0  ;;  %s518_s19 = scalar_lea.sflag [#allocation4], %s517_s13 }
  0xd5   : > { %p1413_p2 = scmp.ge.s32.totalorder %s1411_s5, 2 }
  0xd7   : > { %p724_p5 = pnand %p1413_p2, %p1412_p11 }
  0xd9   : > { %972 = dma.done.wait (!%p724_p5), %s518_s19, 32  }
  0xda   : > { %974 = vsyncadd (!%p724_p5), %s518_s19, 4294967264  ;;  %s26_s20 = sadd.s32 1, %s1411_s5   ;;  %s1414_s23 = sld [smem:[#allocation15_spill]] }
  0xdb   : > { %p23_p7 = scmp.ge.s32.totalorder %s26_s20, 4   ;;  %s1415_s17 = sld [smem:[#allocation19_spill]] }
  0xdc   : > { %s1416_s18 = sld [smem:[#allocation16_spill]]  ;;  %s1417_s19 = sld [smem:[#allocation18_spill]] }
  0xdd   : > { %s1418_s15 = smov %s981_s16  ;;  %25 = sbr.rel (!%p23_p7) target bundleno = 13 (0xd), region = 130 }
  0xe0   : > { %s1419_s16 = smov %s1414_s23 }
  0xe4   :  { %523 = vsyncpa [#allocation3], 1 }
  0xe5   :  { %525 = vsyncpa [#allocation3 + $0x1], 1 }
  0xe6   :  { %526 = vsyncpa [#allocation6], 1 }
  0xe7   :  { %528 = vsyncpa [#allocation6 + $0x1], 1 }
  0xe8   :  { %529 = vsyncpa [#allocation9], 1 }
  0xe9   :  { %531 = vsyncpa [#allocation9 + $0x1], 1 }
  0xea   :  { %532 = vsyncpa [#allocation4], 1 }
  0xeb   :  { %534 = vsyncpa [#allocation4 + $0x1], 1 }

</bundles_post_ra>
